<compile_context>
chip_gen: v7x
topology: tpu7x:2x2x1
jax: 0.10.0
libtpu: 0.0.40
codegen_flags: <defaults>
</compile_context>

<pallas_src>
import math
from functools import partial

import jax
import jax.numpy as jnp
from jax import lax
from jax.experimental import pallas as pl
from jax.experimental.pallas import tpu as pltpu


# ------------------------- fused K/V projection kernel ----------------------- #

def _kv_proj_kernel(x_ref, wk_ref, bk_ref, wv_ref, bv_ref, k_ref, v_ref):
    # One read of the src tile feeds both projections (src is DMA'd once).
    x = x_ref[...].astype(wk_ref.dtype)            # bf16 MXU operands
    k_ref[...] = (jnp.dot(x, wk_ref[...], preferred_element_type=jnp.float32)
                  + bk_ref[...]).astype(k_ref.dtype)
    v_ref[...] = (jnp.dot(x, wv_ref[...], preferred_element_type=jnp.float32)
                  + bv_ref[...]).astype(v_ref.dtype)


def pallas_kv_projection(x2d, wk_t, bk, wv_t, bv, *, row_tile=512,
                         out_dtype=jnp.bfloat16):
    """K = x2d @ wk_t + bk, V = x2d @ wv_t + bv (src read once, bf16 outputs).

    x2d: (N, Din); wk_t/wv_t pre-transposed (Din, Dout) bf16; bk/bv (1, Dout) f32.
    row_tile=512: this kernel is HBM-bound; larger row tiles amortize the
    per-grid-step overhead (~63% -> ~85% of HBM roofline going 256 -> 512).
    """
    N, Din = x2d.shape
    Dk = wk_t.shape[1]
    Dv = wv_t.shape[1]
    tn = min(row_tile, N)
    return pl.pallas_call(
        _kv_proj_kernel,
        out_shape=(
            jax.ShapeDtypeStruct((N, Dk), out_dtype),
            jax.ShapeDtypeStruct((N, Dv), out_dtype),
        ),
        grid=(pl.cdiv(N, tn),),
        in_specs=[
            pl.BlockSpec((tn, Din), lambda i: (i, 0)),
            pl.BlockSpec((Din, Dk), lambda i: (0, 0)),
            pl.BlockSpec((1, Dk), lambda i: (0, 0)),
            pl.BlockSpec((Din, Dv), lambda i: (0, 0)),
            pl.BlockSpec((1, Dv), lambda i: (0, 0)),
        ],
        out_specs=(
            pl.BlockSpec((tn, Dk), lambda i: (i, 0)),
            pl.BlockSpec((tn, Dv), lambda i: (i, 0)),
        ),
        compiler_params=pltpu.CompilerParams(dimension_semantics=("parallel",)),
    )(x2d, wk_t, bk, wv_t, bv)


# ----------------------------- attention kernel ------------------------------ #

def _attn_kernel(t_ref, wq_ref, bq_ref, k_ref, v_ref, wot_ref, bo_ref,
                 o_ref, acc_ref, *, heads_per_block, d_k, d_v):
    # Blocks (head-major packed; grid = (B, Lt-tiles, H/hb) with head-blocks
    # innermost as the reduction axis):
    #   t:   (1, TLt, target_dim)            wq: (target_dim, hb*d_k) bf16
    #   bq:  (1, hb*d_k) f32 (scale folded in)
    #   k:   (1, L, hb*d_k) bf16             v:  (1, L, hb*d_v) bf16
    #   wot: (hb*d_v, out_dim) bf16          bo: (1, out_dim) f32
    #   o:   (1, TLt, out_dim)               acc (scratch f32): (TLt, out_dim)
    hblk = pl.program_id(2)

    @pl.when(hblk == 0)
    def _():
        acc_ref[...] = jnp.zeros_like(acc_ref)

    # Fused Q projection for this head block; the softmax scale is already
    # folded into wq/bq at init, so no per-step scaling multiply is needed.
    t = t_ref[0].astype(wq_ref.dtype)
    q = (jnp.dot(t, wq_ref[...], preferred_element_type=jnp.float32)
         + bq_ref[...]).astype(k_ref.dtype)                       # (TLt, hb*d_k)

    k = k_ref[0]                                                   # (L, hb*d_k)
    v = v_ref[0]                                                   # (L, hb*d_v)

    head_outs = []
    for h in range(heads_per_block):                # static, lane-aligned slices
        qh = q[:, h * d_k:(h + 1) * d_k]
        kh = k[:, h * d_k:(h + 1) * d_k]
        vh = v[:, h * d_v:(h + 1) * d_v]
        # scores: contract on d_k of both operands (MXU-native, no k transpose).
        s = lax.dot_general(qh, kh, dimension_numbers=(((1,), (1,)), ((), ())),
                            preferred_element_type=jnp.float32)    # (TLt, L)
        # numerically-stable softmax; reciprocal goes to the EUP slot.
        # NOTE: rows belonging to Lt padding may be garbage but softmax /
        # matmuls are row-wise, so they never contaminate valid rows and are
        # dropped by the masked partial-block store.
        m = jnp.max(s, axis=-1, keepdims=True)
        p = jnp.exp(s - m)
        denom = jnp.sum(p, axis=-1, keepdims=True)
        attn = (p * pl.reciprocal(denom, approx=True)).astype(vh.dtype)
        head_outs.append(jnp.dot(attn, vh,
                                 preferred_element_type=jnp.float32))  # (TLt, d_v)

    # Fused output projection: this head block's contribution to y = out @ Wo^T.
    # With hb=2 the contraction is 2*d_v wide (fills a 256-wide MXU).
    head_out = jnp.concatenate(head_outs, axis=-1).astype(wot_ref.dtype)
    acc_ref[...] += jnp.dot(head_out, wot_ref[...],
                            preferred_element_type=jnp.float32)    # (TLt, out_dim)

    @pl.when(hblk == pl.num_programs(2) - 1)
    def _():
        o_ref[0] = (acc_ref[...] + bo_ref[...]).astype(o_ref.dtype)


def pallas_attention(target, k, v, wq_t, bq, wo_t, bo, *, num_heads, d_k, d_v,
                     heads_per_block=2, lt_tile=256, out_dtype=None):
    """target: (B, Lt, target_dim); k: (B, L, H*d_k); v: (B, L, H*d_v) (head-major).

    Computes Q = target @ wq_t + bq in-kernel (Q never hits HBM) and returns the
    final projected output (B, Lt, out_dim) — Wo is fused into the head
    reduction, so the concatenated-head tensor never hits HBM either.
    """
    B, Lt, target_dim = target.shape
    L = k.shape[1]
    out_dim = wo_t.shape[1]
    if out_dtype is None:
        out_dtype = target.dtype
    hb = heads_per_block if num_heads % heads_per_block == 0 else 1
    n_hblk = num_heads // hb
    tlt = min(lt_tile, Lt)

    kernel = partial(_attn_kernel, heads_per_block=hb, d_k=d_k, d_v=d_v)
    return pl.pallas_call(
        kernel,
        out_shape=jax.ShapeDtypeStruct((B, Lt, out_dim), out_dtype),
        grid=(B, pl.cdiv(Lt, tlt), n_hblk),
        in_specs=[
            pl.BlockSpec((1, tlt, target_dim), lambda b, lt, h: (b, lt, 0)),
            pl.BlockSpec((target_dim, hb * d_k), lambda b, lt, h: (0, h)),
            pl.BlockSpec((1, hb * d_k), lambda b, lt, h: (0, h)),
            pl.BlockSpec((1, L, hb * d_k), lambda b, lt, h: (b, 0, h)),
            pl.BlockSpec((1, L, hb * d_v), lambda b, lt, h: (b, 0, h)),
            pl.BlockSpec((hb * d_v, out_dim), lambda b, lt, h: (h, 0)),
            pl.BlockSpec((1, out_dim), lambda b, lt, h: (0, 0)),
        ],
        out_specs=pl.BlockSpec((1, tlt, out_dim), lambda b, lt, h: (b, lt, 0)),
        scratch_shapes=[pltpu.VMEM((tlt, out_dim), jnp.float32)],
        compiler_params=pltpu.CompilerParams(
            dimension_semantics=("parallel", "parallel", "arbitrary")),
    )(target, wq_t, bq, k, v, wo_t, bo)


# -------------------------------- module glue -------------------------------- #

class MultiHeadAttentionPallas:
    def __init__(self, src_dim, target_dim, out_dim, d_k, d_v=None,
                 num_heads=8, *, key, compute_dtype=jnp.bfloat16):
        if d_v is None:
            d_v = d_k
        # Required by the reference module's Wo = Linear(d_k, out_dim) applied
        # to the (num_heads*d_v)-wide concatenated heads.
        assert num_heads * d_v == d_k
        self.d_k = d_k
        self.d_v = d_v
        self.num_heads = num_heads
        self.norm_factor = 1.0 / math.sqrt(d_k * num_heads)
        # 2-head blocking fills a 256-wide MXU when d_v == 128; harmless on v5e.
        self.heads_per_block = 2 if num_heads % 2 == 0 else 1

        ks = jax.random.split(key, 8)

        def init_linear(kw, kb, fan_in, fan_out):
            # PyTorch nn.Linear default init: U(-1/sqrt(fan_in), 1/sqrt(fan_in))
            bound = 1.0 / math.sqrt(fan_in)
            w = jax.random.uniform(kw, (fan_out, fan_in), jnp.float32, -bound, bound)
            b = jax.random.uniform(kb, (fan_out,), jnp.float32, -bound, bound)
            return w, b

        # PyTorch-layout f32 parameters (kept for the reference check).
        self.Wk = init_linear(ks[0], ks[1], src_dim, d_k * num_heads)
        self.Wq = init_linear(ks[2], ks[3], target_dim, d_k * num_heads)
        self.Wv = init_linear(ks[4], ks[5], src_dim, d_v * num_heads)
        self.Wo = init_linear(ks[6], ks[7], d_k, out_dim)

        # Kernel-side parameters, prepared ONCE at init (free layout plumbing):
        #  * permute output rows '(d h)' -> '(h d)' (head-major) so per-head
        #    slices of the projection outputs are contiguous lane ranges,
        #  * pre-transpose to (Din, Dout), bias as (1, Dout),
        #  * weights in bf16 (MXU operands), biases in f32 (added post-f32-acc),
        #  * fold the softmax scale into the Q projection weights and bias.
        H = num_heads

        def head_major_t(w, b, dh):
            w_hm = w.reshape(dh, H, -1).transpose(1, 0, 2).reshape(H * dh, -1)
            b_hm = b.reshape(dh, H).T.reshape(H * dh)
            return jnp.asarray(w_hm.T), jnp.asarray(b_hm.reshape(1, -1))

        wk_t, bk = head_major_t(*self.Wk, d_k)
        wq_t, bq = head_major_t(*self.Wq, d_k)
        wv_t, bv = head_major_t(*self.Wv, d_v)

        self.wk_t = wk_t.astype(compute_dtype)
        self.bk = bk                                            # f32
        self.wv_t = wv_t.astype(compute_dtype)
        self.bv = bv                                            # f32
        self.wq_t = (wq_t * self.norm_factor).astype(compute_dtype)
        self.bq = bq * self.norm_factor                         # f32, scale folded
        # Wo consumes the '(h d)' (already head-major) concatenation.
        self.wo_t = self.Wo[0].T.astype(compute_dtype)          # (d_k, out_dim)
        self.bo = self.Wo[1].reshape(1, -1)                     # (1, out_dim) f32

    def __call__(self, src, target, mask=None):
        # TODO(synk): attention `mask` path not implemented; mask=None only.
        assert mask is None
        B, L, _ = src.shape
        _, Lt, _ = target.shape
        H, dk, dv = self.num_heads, self.d_k, self.d_v

        # Fused K/V projection (src read from HBM once), bf16 outputs.
        K, V = pallas_kv_projection(src.reshape(B * L, -1),
                                    self.wk_t, self.bk, self.wv_t, self.bv)

        # Head-major packed (free reshapes, no transposes).
        K = K.reshape(B, L, H * dk)
        V = V.reshape(B, L, H * dv)

        # Attention with the Q projection and the output projection Wo fused in.
        return pallas_attention(target, K, V, self.wq_t, self.bq,
                                self.wo_t, self.bo,
                                num_heads=H, d_k=dk, d_v=dv,
                                heads_per_block=self.heads_per_block,
                                out_dtype=target.dtype)


# ------------------------------ reference (JAX) ------------------------------ #

def reference_forward(mha, src, target):
    hi = jax.lax.Precision.HIGHEST

    def lin(x, w, b):
        return jnp.dot(x, w.T, precision=hi) + b

    B, L, _ = src.shape
    _, Lt, _ = target.shape
    H, dk, dv = mha.num_heads, mha.d_k, mha.d_v
    # Original semantics: '(d h)' head split, then 'b h i d -> b i (h d)' merge.
    K = lin(src, *mha.Wk).reshape(B, L, dk, H).transpose(0, 3, 1, 2)
    V = lin(src, *mha.Wv).reshape(B, L, dv, H).transpose(0, 3, 1, 2)
    Q = lin(target, *mha.Wq).reshape(B, Lt, dk, H).transpose(0, 3, 1, 2)
    s = jnp.einsum('bhid,bhjd->bhij', Q, K, precision=hi) * mha.norm_factor
    a = jax.nn.softmax(s, axis=-1)
    o = jnp.einsum('bhij,bhjd->bhid', a, V, precision=hi)
    o = o.transpose(0, 2, 1, 3).reshape(B, Lt, H * dv)
    return lin(o, *mha.Wo)


# ----------------------------------- main ------------------------------------ #

if __name__ == "__main__":
    # Small shapes chosen so per-head feature dims are 128-aligned (lane-dense
    # MXU tiles) and num_heads * d_v == d_k as the module requires.
    B, L, Lt = 2, 8, 8
    src_dim, target_dim = 32, 32
    num_heads, d_v = 2, 128
    d_k = num_heads * d_v          # 256
    out_dim = 128

    key = jax.random.PRNGKey(0)
    k_param, k_src, k_tgt = jax.random.split(key, 3)

    mha = MultiHeadAttentionPallas(src_dim, target_dim, out_dim, d_k,
                                   d_v=d_v, num_heads=num_heads, key=k_param)

    src = jax.random.normal(k_src, (B, L, src_dim), jnp.float32)
    target = jax.random.normal(k_tgt, (B, Lt, target_dim), jnp.float32)

    y = jax.block_until_ready(mha(src, target))

    y_ref = reference_forward(mha, src, target)
    assert y.shape == (B, Lt, out_dim)
    # Tolerance covers bf16 intermediates/weights and the EUP approximate
    # reciprocal in the softmax normalization (reference runs in f32 HIGHEST).
    assert jnp.allclose(y, y_ref, atol=5e-2, rtol=5e-2), \
        float(jnp.max(jnp.abs(y - y_ref)))

    print("KERNEL_OK")
</pallas_src>

<mosaic_0001>
module attributes {stable_mosaic.version = 11 : i64} {
  func.func @_kv_proj_kernel(%arg0: i32, %arg1: memref<16x32xf32, #tpu.memory_space<vmem>>, %arg2: memref<32x512xbf16, #tpu.memory_space<vmem>>, %arg3: memref<1x512xf32, #tpu.memory_space<vmem>>, %arg4: memref<32x256xbf16, #tpu.memory_space<vmem>>, %arg5: memref<1x256xf32, #tpu.memory_space<vmem>>, %arg6: memref<16x512xbf16, #tpu.memory_space<vmem>>, %arg7: memref<16x256xbf16, #tpu.memory_space<vmem>>) attributes {dimension_semantics = [#tpu.dimension_semantics<parallel>], iteration_bounds = array<i64: 1>, scalar_prefetch = 0 : i64, scratch_operands = 0 : i64, tpu.core_type = #tpu.core_type<tc>, window_params = [{transform_indices = @transform_0, window_bounds = array<i64: 16, 32>}, {pipeline_mode = #tpu.pipeline_mode<synchronous>, transform_indices = @transform_1, window_bounds = array<i64: 32, 512>}, {pipeline_mode = #tpu.pipeline_mode<synchronous>, transform_indices = @transform_2, window_bounds = array<i64: 1, 512>}, {pipeline_mode = #tpu.pipeline_mode<synchronous>, transform_indices = @transform_3, window_bounds = array<i64: 32, 256>}, {pipeline_mode = #tpu.pipeline_mode<synchronous>, transform_indices = @transform_4, window_bounds = array<i64: 1, 256>}, {transform_indices = @transform_5, window_bounds = array<i64: 16, 512>}, {transform_indices = @transform_6, window_bounds = array<i64: 16, 256>}]} {
    %c0 = arith.constant 0 : index
    %c0_0 = arith.constant 0 : index
    %0 = vector.load %arg1[%c0, %c0_0] : memref<16x32xf32, #tpu.memory_space<vmem>>, vector<16x32xf32>
    %1 = arith.truncf %0 : vector<16x32xf32> to vector<16x32xbf16>
    %c0_1 = arith.constant 0 : index
    %c0_2 = arith.constant 0 : index
    %2 = vector.load %arg2[%c0_1, %c0_2] : memref<32x512xbf16, #tpu.memory_space<vmem>>, vector<32x512xbf16>
    %cst = arith.constant dense<0.000000e+00> : vector<16x512xf32>
    %3 = tpu.matmul %1, %2, %cst {dimension_numbers = #tpu.dot_dimension_numbers<[1], [0], [0], [1], [0, 0, 1, 1], [], []>} : vector<16x32xbf16>, vector<32x512xbf16>, vector<16x512xf32> -> vector<16x512xf32>
    %c0_3 = arith.constant 0 : index
    %c0_4 = arith.constant 0 : index
    %4 = vector.load %arg3[%c0_3, %c0_4] : memref<1x512xf32, #tpu.memory_space<vmem>>, vector<1x512xf32>
    %5 = vector.broadcast %4 : vector<1x512xf32> to vector<16x512xf32>
    %6 = arith.addf %3, %5 : vector<16x512xf32>
    %7 = arith.truncf %6 : vector<16x512xf32> to vector<16x512xbf16>
    %c0_5 = arith.constant 0 : index
    %c0_6 = arith.constant 0 : index
    %8 = vector.load %arg6[%c0_5, %c0_6] : memref<16x512xbf16, #tpu.memory_space<vmem>>, vector<16x512xbf16>
    tpu.vector_store %arg6[%c0_5, %c0_6], %7 {strides = array<i32>} : memref<16x512xbf16, #tpu.memory_space<vmem>>, vector<16x512xbf16>,
    %c0_7 = arith.constant 0 : index
    %c0_8 = arith.constant 0 : index
    %9 = vector.load %arg4[%c0_7, %c0_8] : memref<32x256xbf16, #tpu.memory_space<vmem>>, vector<32x256xbf16>
    %cst_9 = arith.constant dense<0.000000e+00> : vector<16x256xf32>
    %10 = tpu.matmul %1, %9, %cst_9 {dimension_numbers = #tpu.dot_dimension_numbers<[1], [0], [0], [1], [0, 0, 1, 1], [], []>} : vector<16x32xbf16>, vector<32x256xbf16>, vector<16x256xf32> -> vector<16x256xf32>
    %c0_10 = arith.constant 0 : index
    %c0_11 = arith.constant 0 : index
    %11 = vector.load %arg5[%c0_10, %c0_11] : memref<1x256xf32, #tpu.memory_space<vmem>>, vector<1x256xf32>
    %12 = vector.broadcast %11 : vector<1x256xf32> to vector<16x256xf32>
    %13 = arith.addf %10, %12 : vector<16x256xf32>
    %14 = arith.truncf %13 : vector<16x256xf32> to vector<16x256xbf16>
    %c0_12 = arith.constant 0 : index
    %c0_13 = arith.constant 0 : index
    %15 = vector.load %arg7[%c0_12, %c0_13] : memref<16x256xbf16, #tpu.memory_space<vmem>>, vector<16x256xbf16>
    tpu.vector_store %arg7[%c0_12, %c0_13], %14 {strides = array<i32>} : memref<16x256xbf16, #tpu.memory_space<vmem>>, vector<16x256xbf16>,
    return
  }
  func.func @transform_0(%arg0: i32) -> (i32, i32) {
    %c0_i32 = arith.constant 0 : i32
    %c0_i32_0 = arith.constant 0 : i32
    return %arg0, %c0_i32 : i32, i32
  }
  func.func @transform_1(%arg0: i32) -> (i32, i32) {
    %c0_i32 = arith.constant 0 : i32
    %c0_i32_0 = arith.constant 0 : i32
    %c0_i32_1 = arith.constant 0 : i32
    return %c0_i32, %c0_i32_0 : i32, i32
  }
  func.func @transform_2(%arg0: i32) -> (i32, i32) {
    %c0_i32 = arith.constant 0 : i32
    %c0_i32_0 = arith.constant 0 : i32
    %c0_i32_1 = arith.constant 0 : i32
    return %c0_i32, %c0_i32_0 : i32, i32
  }
  func.func @transform_3(%arg0: i32) -> (i32, i32) {
    %c0_i32 = arith.constant 0 : i32
    %c0_i32_0 = arith.constant 0 : i32
    %c0_i32_1 = arith.constant 0 : i32
    return %c0_i32, %c0_i32_0 : i32, i32
  }
  func.func @transform_4(%arg0: i32) -> (i32, i32) {
    %c0_i32 = arith.constant 0 : i32
    %c0_i32_0 = arith.constant 0 : i32
    %c0_i32_1 = arith.constant 0 : i32
    return %c0_i32, %c0_i32_0 : i32, i32
  }
  func.func @transform_5(%arg0: i32) -> (i32, i32) {
    %c0_i32 = arith.constant 0 : i32
    %c0_i32_0 = arith.constant 0 : i32
    return %arg0, %c0_i32 : i32, i32
  }
  func.func @transform_6(%arg0: i32) -> (i32, i32) {
    %c0_i32 = arith.constant 0 : i32
    %c0_i32_0 = arith.constant 0 : i32
    return %arg0, %c0_i32 : i32, i32
  }
}

</mosaic_0001>

<bundles_post_ra>
// kernel: tpu_custom_call.1
= control target key start
LH: loop header
LB: loop body
LE: loop exit
PB: predicated region body
PF: predicated region fallthrough
CT: control target
= control target key end

     0   :  { %12 = vsyncpa [#allocation3], 0  ;;  %s683_s0 = inlined_call_operand.hbm [shape: f32[16,32], index: 0, kind: input, shape index: {}]   ;;  %s684_s1 = inlined_call_operand.hbm [shape: bf16[32,512], index: 1, kind: input, shape index: {}]   ;;  %s685_s2 = inlined_call_operand.vmem [shape: f32[1,512], index: 2, kind: input, shape index: {}]   ;;  %s686_s3 = inlined_call_operand.hbm [shape: bf16[32,256], index: 3, kind: input, shape index: {}]   ;;  %s687_s4 = inlined_call_operand.vmem [shape: f32[1,256], index: 4, kind: input, shape index: {}]   ;;  %s688_s5 = inlined_call_operand.hbm [shape: bf16[16,512], index: 5, kind: output, shape index: {0}]   ;;  %s689_s6 = inlined_call_operand.hbm [shape: bf16[16,256], index: 6, kind: output, shape index: {1}]  }
   0x1   :  { %13 = vsyncpa [#allocation6], 0 }
   0x2   :  { %14 = vsyncpa [#allocation4], 0 }
   0x3   :  { %15 = vsyncpa [#allocation10], 0  ;;  %s557_s21 = smov [#allocation5]   ;;  %s439_s25 = scalar_lea.hbm %s684_s1, 1024 }
   0x4   :  { %s33_s22 = sshll.u32 %s557_s21, 4  ;;  %p440_p0 = scmp.ne.s32.totalorder %s684_s1, %s439_s25  ;;  %s34_s22 = int_to_ptr.vmem [resolvable:$true] %s33_s22 }
   0x5   :  { %p443_p1 = scmp.lt.u32.totalorder %s439_s25, %s684_s1 }
   0x7   :  { %p445_p2 = pnand %p443_p1, %p440_p0 }
   0x9   :  { %448 = shalt.err (!%p445_p2)
}
   0xa   :  { %s449_s30 = scalar_lea.vmem %s34_s22, 1024  ;;  %p454_p4 = scmp.lt.s32.totalorder %s34_s22, %s34_s22 }
   0xb   :  { %p450_p3 = scmp.ne.s32.totalorder %s34_s22, %s449_s30  ;;  %p455_p5 = scmp.lt.s32.totalorder %s449_s30, %s449_s30 }
   0xd   :  { %p456_p6 = por %p455_p5, %p454_p4 }
   0xf   :  { %p457_p7 = pnand %p456_p6, %p450_p3 }
  0x11   :  { %460 = shalt.err (!%p457_p7)
}
  0x12   :  { %s558_s7 = smov 256   ;;  %s559_s8 = smov 16  }
  0x13   :  { %39 = dma.hbm_to_vmem [thread:$0]  %s684_s1, 1024, %s34_s22, [#allocation6], %s558_s7, %s558_s7, %s559_s8  }
  0x14   :  { %s560_s11 = smov [#allocation2]   ;;  %s461_s15 = scalar_lea.hbm %s683_s0, 256 }
  0x15   :  { %s21_s12 = sshll.u32 %s560_s11, 4  ;;  %p462_p8 = scmp.ne.s32.totalorder %s683_s0, %s461_s15  ;;  %s22_s12 = int_to_ptr.vmem [resolvable:$true] %s21_s12 }
  0x16   :  { %p465_p9 = scmp.lt.u32.totalorder %s461_s15, %s683_s0 }
  0x18   :  { %p467_p10 = pnand %p465_p9, %p462_p8 }
  0x1a   :  { %470 = shalt.err (!%p467_p10)
}
  0x1b   :  { %s471_s20 = scalar_lea.vmem %s22_s12, 256  ;;  %p476_p12 = scmp.lt.s32.totalorder %s22_s12, %s22_s12 }
  0x1c   :  { %p472_p11 = scmp.ne.s32.totalorder %s22_s12, %s471_s20  ;;  %p477_p13 = scmp.lt.s32.totalorder %s471_s20, %s471_s20 }
  0x1e   :  { %p478_p0 = por %p477_p13, %p476_p12 }
  0x20   :  { %p479_p1 = pnand %p478_p0, %p472_p11 }
  0x22   :  { %482 = shalt.err (!%p479_p1)
}
  0x23   :  { %s561_s1 = smov 128   ;;  %s562_s21 = smov 8  }
  0x24   :  { %27 = dma.hbm_to_vmem [thread:$0]  %s683_s0, 256, %s22_s12, [#allocation3], %s561_s1, %s561_s1, %s562_s21  }
  0x25   :  { %s563_s24 = smov [#allocation7]   ;;  %s483_s28 = scalar_lea.hbm %s686_s3, 512 }
  0x26   :  { %s47_s25 = sshll.u32 %s563_s24, 4  ;;  %p484_p2 = scmp.ne.s32.totalorder %s686_s3, %s483_s28  ;;  %s48_s25 = int_to_ptr.vmem [resolvable:$true] %s47_s25 }
  0x27   :  { %p487_p3 = scmp.lt.u32.totalorder %s483_s28, %s686_s3 }
  0x29   :  { %p489_p4 = pnand %p487_p3, %p484_p2 }
  0x2b   :  { %492 = shalt.err (!%p489_p4)
}
  0x2c   :  { %s493_s11 = scalar_lea.vmem %s48_s25, 512  ;;  %p498_p6 = scmp.lt.s32.totalorder %s48_s25, %s48_s25 }
  0x2d   :  { %p494_p5 = scmp.ne.s32.totalorder %s48_s25, %s493_s11  ;;  %p499_p7 = scmp.lt.s32.totalorder %s493_s11, %s493_s11 }
  0x2f   :  { %p500_p8 = por %p499_p7, %p498_p6 }
  0x31   :  { %p501_p9 = pnand %p500_p8, %p494_p5 }
  0x33   :  { %504 = shalt.err (!%p501_p9)
}
  0x34   :  { %53 = dma.hbm_to_vmem [thread:$0]  %s686_s3, 512, %s48_s25, [#allocation6], %s561_s1, %s561_s1, %s562_s21  }
  0x35   :  { %549 = dma.done.wait [#allocation3], 256  }
  0x36   :  { %550 = vsyncadd [#allocation3], 4294967040 }
  0x37   :  { %551 = dma.done.wait [#allocation6], 1536  }
  0x38   :  { %552 = vsyncadd [#allocation6], 4294965760  ;;  %v564_v0 = vmov 0   ;;  %v421_v1 = vld [vmem:[#allocation5 + $0x4] ss:$16 sps:$4 sm:$0xff]   ;;  %v67_v8 = vld [vmem:[#allocation2 + $0x8] sm:$0xff]  ;;  %v79_v16 = vlaneseq }
  0x39   :  { %175 = vmatprep.mubr.bf16.mxu0 %v564_v0  ;;  %218 = vmatprep.mubr.bf16.mxu1 %v564_v0  ;;  %v423_v2 = vld [vmem:[#allocation5] ss:$16 sps:$4 sm:$0xff]   ;;  %v424_v3 = vld [vmem:[#allocation5 + $0x24] ss:$16 sps:$4 sm:$0xff]   ;;  %v427_v5 = vld [vmem:[#allocation5 + $0xc] ss:$16 sps:$4 sm:$0xff]  }
  0x3a   :  { %143 = vmatprep.subr.bf16.mxu0 %v421_v1  ;;  %v426_v4 = vld [vmem:[#allocation5 + $0x20] ss:$16 sps:$4 sm:$0xff]   ;;  %v429_v6 = vld [vmem:[#allocation5 + $0x8] ss:$16 sps:$4 sm:$0xff]   ;;  %186 = vmatprep.subr.bf16.mxu1 %v427_v5  ;;  %v432_v10 = vld [vmem:[#allocation7 + $0x4] ss:$8 sps:$4 sm:$0xff]  }
  0x3b   :  { %144 = vmatpush1.bf16.msra.mxu0 %v423_v2  ;;  %v66_v7 = vld [vmem:[#allocation2] sm:$0xff]  ;;  %v430_v9 = vld [vmem:[#allocation7] ss:$8 sps:$4 sm:$0xff]   ;;  %187 = vmatpush1.bf16.msra.mxu1 %v429_v6  ;;  %v433_v12 = vld [vmem:[#allocation5 + $0x2c] ss:$16 sps:$4 sm:$0xff]   ;;  %vm139_vm0 = vcmask 261120  }
  0x3c   :  { %145 = vmatprep.subr.bf16.mxu0 %v424_v3  ;;  %v68_v11 = vpack.c.bf16 %v67_v8, %v66_v7  ;;  %v435_v13 = vld [vmem:[#allocation5 + $0x28] ss:$16 sps:$4 sm:$0xff]   ;;  %188 = vmatprep.subr.bf16.mxu1 %v433_v12  ;;  %v438_v14 = vld [vmem:[#allocation7 + $0x14] ss:$8 sps:$4 sm:$0xff]   ;;  %v80_v17 = vshrl.u32 %v79_v16, 7 }
  0x3d   :  { %v436_v15 = vld [vmem:[#allocation7 + $0x10] ss:$8 sps:$4 sm:$0xff]  }
  0x3e   :  { %v81_v18 = vsub.s32 0, %v80_v17  ;;  %v77_v19 = vld [vmem:[%s685_s2] sm:$0xf]  ;;  %v85_v20 = vsub.s32 1, %v80_v17  ;;  %v89_v21 = vsub.s32 2, %v80_v17  ;;  %v93_v23 = vsub.s32 3, %v80_v17 }
  0x3f   :  { %146 = vmatpush1.bf16.msra.mxu0 %v426_v4  ;;  %189 = vmatpush1.bf16.msra.mxu1 %v435_v13  ;;  %v261_v32 = vld [vmem:[%s687_s4] sm:$0x3]  ;;  %s565_s2 = smov [#allocation8]   ;;  %s566_s4 = smov [#allocation9]  }
  0x40   :  { %293 = vmatprep.subr.bf16.mxu0 %v432_v10  ;;  %v82_v22 = vrot.slane %v77_v19, %v81_v18  ;;  %v86_v24 = vrot.slane %v77_v19, %v85_v20  ;;  %v90_v26 = vrot.slane %v77_v19, %v89_v21  ;;  %v94_v29 = vrot.slane %v77_v19, %v93_v23  ;;  %s355_s16 = sshll.u32 %s565_s2, 4  ;;  %s367_s17 = sshll.u32 %s566_s4, 4  ;;  %s356_s16 = int_to_ptr.vmem [resolvable:$true] %s355_s16  ;;  %s368_s17 = int_to_ptr.vmem [resolvable:$true] %s367_s17 }
  0x41   :  { %v266_v42 = vrot.slane %v261_v32, %v81_v18  ;;  %v270_v46 = vrot.slane %v261_v32, %v85_v20  ;;  %s505_s18 = scalar_lea.vmem %s356_s16, 512  ;;  %p510_p11 = scmp.lt.s32.totalorder %s356_s16, %s356_s16 }
  0x42   :  { %392 = vmatmul.mubr.msk.bf16.vlgmr.msra.gmra.mrb[0].mxu0 %vm139_vm0, %v68_v11  ;;  %393 = vmatmul.mubr.msk.bf16.vlgmr.msra.gmra.mrb[0].mxu1 %vm139_vm0, %v68_v11  ;;  %p506_p10 = scmp.ne.s32.totalorder %s356_s16, %s505_s18  ;;  %p511_p12 = scmp.lt.s32.totalorder %s505_s18, %s505_s18 }
  0x43   :  { %294 = vmatpush1.bf16.msra.mxu0 %v430_v9  ;;  %325 = vmatprep.mubr.bf16.mxu0 %v564_v0 }
  0x44   :  { %295 = vmatprep.subr.bf16.mxu0 %v438_v14  ;;  %p512_p13 = por %p511_p12, %p510_p11 }
  0x46   :  { %p513_p0 = pnand %p512_p13, %p506_p10 }
  0x47   :  { %296 = vmatpush1.bf16.msra.mxu0 %v436_v15 }
  0x4a   :  { %402 = vmatmul.mubr.msk.bf16.vlgmr.msra.gmra.mrb[4].mxu0 %vm139_vm0, %v68_v11 }
 0x115   :  { %v177_v25 = vpop.f32.mrb[0].mxu0  ;;  %v220_v35 = vpop.f32.mrb[0].mxu1 }
 0x116   :  { %v178_v27 = vadd.f32 %v177_v25, %v82_v22  ;;  %v179_v28 = vpop.f32.mrb[1].mxu0  ;;  %v221_v38 = vadd.f32 %v220_v35, %v90_v26  ;;  %v222_v39 = vpop.f32.mrb[1].mxu1 }
 0x117   :  { %v180_v30 = vadd.f32 %v179_v28, %v86_v24  ;;  %v181_v31 = vpop.f32.mrb[2].mxu0  ;;  %v223_v40 = vadd.f32 %v222_v39, %v94_v29  ;;  %v224_v41 = vpop.f32.mrb[2].mxu1 }
 0x118   :  { %v182_v33 = vadd.f32 %v181_v31, %v82_v22  ;;  %v183_v34 = vpop.f32.mrb[3].mxu0  ;;  %v225_v44 = vadd.f32 %v224_v41, %v90_v26  ;;  %v226_v45 = vpop.f32.mrb[3].mxu1 }
 0x119   :  { %v405_v36 = vpack.c.bf16 %v180_v30, %v178_v27  ;;  %v184_v37 = vadd.f32 %v183_v34, %v86_v24  ;;  %v406_v47 = vpack.c.bf16 %v223_v40, %v221_v38  ;;  %v227_v48 = vadd.f32 %v226_v45, %v94_v29 }
 0x11b   :  { %253 = vst [vmem:[#allocation8] sm:$0xff] %v405_v36  ;;  %v407_v43 = vpack.c.bf16 %v184_v37, %v182_v33  ;;  %254 = vst [vmem:[#allocation8 + $0x8] sm:$0xff] %v406_v47  ;;  %v408_v51 = vpack.c.bf16 %v227_v48, %v225_v44 }
 0x11d   :  { %255 = vst [vmem:[#allocation8 + $0x10] sm:$0xff] %v407_v43  ;;  %v327_v49 = vpop.f32.mrb[4].mxu0  ;;  %256 = vst [vmem:[#allocation8 + $0x18] sm:$0xff] %v408_v51 }
 0x11e   :  { %v328_v50 = vadd.f32 %v327_v49, %v266_v42  ;;  %v329_v52 = vpop.f32.mrb[5].mxu0 }
 0x11f   :  { %v330_v53 = vadd.f32 %v329_v52, %v270_v46  ;;  %v331_v54 = vpop.f32.mrb[6].mxu0 }
 0x120   :  { %v332_v55 = vadd.f32 %v331_v54, %v266_v42  ;;  %v333_v56 = vpop.f32.mrb[7].mxu0 }
 0x121   :  { %v409_v57 = vpack.c.bf16 %v330_v53, %v328_v50  ;;  %v334_v58 = vadd.f32 %v333_v56, %v270_v46 }
 0x122   :  { %516 = shalt.err (!%p513_p0)
}
 0x123   :  { %s517_s22 = scalar_lea.hbm %s688_s5, 512 }
 0x124   :  { %p518_p1 = scmp.ne.s32.totalorder %s688_s5, %s517_s22  ;;  %p521_p2 = scmp.lt.u32.totalorder %s517_s22, %s688_s5 }
 0x126   :  { %p523_p3 = pnand %p521_p2, %p518_p1 }
 0x128   :  { %526 = shalt.err (!%p523_p3)
}
 0x129   :  { %361 = dma.vmem_to_hbm [thread:$0]  %s356_s16, 512, %s688_s5, [#allocation4], %s558_s7, %s558_s7, %s559_s8   ;;  %348 = vst [vmem:[#allocation9] sm:$0xff] %v409_v57  ;;  %v410_v59 = vpack.c.bf16 %v334_v58, %v332_v55 }
 0x12a   :  { %s527_s29 = scalar_lea.vmem %s368_s17, 256  ;;  %p532_p5 = scmp.lt.s32.totalorder %s368_s17, %s368_s17 }
 0x12b   :  { %349 = vst [vmem:[#allocation9 + $0x8] sm:$0xff] %v410_v59  ;;  %p528_p4 = scmp.ne.s32.totalorder %s368_s17, %s527_s29  ;;  %p533_p6 = scmp.lt.s32.totalorder %s527_s29, %s527_s29 }
 0x12d   :  { %p534_p7 = por %p533_p6, %p532_p5 }
 0x12f   :  { %p535_p8 = pnand %p534_p7, %p528_p4 }
 0x131   :  { %538 = shalt.err (!%p535_p8)
}
 0x132   :  { %s539_s10 = scalar_lea.hbm %s689_s6, 256 }
 0x133   :  { %p540_p9 = scmp.ne.s32.totalorder %s689_s6, %s539_s10  ;;  %p543_p10 = scmp.lt.u32.totalorder %s539_s10, %s689_s6 }
 0x135   :  { %p545_p11 = pnand %p543_p10, %p540_p9 }
 0x137   :  { %548 = shalt.err (!%p545_p11)
}
 0x138   :  { %373 = dma.vmem_to_hbm [thread:$0]  %s368_s17, 256, %s689_s6, [#allocation10], %s561_s1, %s561_s1, %s562_s21  }
 0x139   :  { %553 = dma.done.wait [#allocation4], 512  }
 0x13a   :  { %554 = vsyncadd [#allocation4], 4294966784 }
 0x13b   :  { %555 = dma.done.wait [#allocation10], 256  }
 0x13c   :  { %556 = vsyncadd [#allocation10], 4294967040 }
 0x13d   :  { %380 = vsyncpa [#allocation3], 1 }
 0x13e   :  { %381 = vsyncpa [#allocation6], 1 }
 0x13f   :  { %382 = vsyncpa [#allocation4], 1 }
 0x140   :  { %383 = vsyncpa [#allocation10], 1 }

</bundles_post_ra>
